<compile_context>
chip_gen: v6e
topology: v6e:2x2x1
jax: 0.10.0
libtpu: 0.0.40
codegen_flags: <defaults>
</compile_context>

<pallas_src>
import jax
import jax.numpy as jnp
from jax.experimental import pallas as pl
from jax.experimental.pallas import tpu as pltpu


# -------------------------- Pallas kernel -----------------------------------
def _sage_pool_kernel(adj_ref, dinv_ref, selfb_ref, pool_ref, pw_ref, acc_ref):
    """acc[c] += pool_rows @ relu((A_rows @ pw) * (1/deg) + (pos@W_r + b))."""
    @pl.when(pl.program_id(1) == 0)
    def _init():
        acc_ref[...] = jnp.zeros_like(acc_ref)

    # Binary int8 adjacency block -> bf16 (exact values 0/1), contracted at
    # h0 lanes against the VMEM-resident bf16 neighbor projection pw.
    agg = jnp.dot(adj_ref[...].astype(jnp.bfloat16), pw_ref[...],
                  preferred_element_type=jnp.float32)            # [tn, h0] f32
    # Exact f32 mean scale + precomputed self term, then ReLU.
    h = jnp.maximum(agg * dinv_ref[...] + selfb_ref[...], 0.0)   # [tn, h0] f32
    # Partial global_mean_pool contribution of this row block (kept in f32).
    acc_ref[...] += jnp.dot(pool_ref[...], h, preferred_element_type=jnp.float32)


# -------------------------- sizing helpers -----------------------------------
def _vmem_budget_bytes():
    try:
        phys = int(pltpu.get_tpu_info().vmem_capacity_bytes)
    except Exception:
        phys = 64 * 1024 * 1024          # conservative (v7x-sized) fallback
    return max(32 * 1024 * 1024, int(phys * 0.75))


def _pick_row_tile(N, B, h0, budget, requested=None):
    """Largest lane-dense row tile whose working set fits the VMEM budget."""
    def vmem_need(tn):
        adj = 2 * tn * N                         # int8, double buffered
        selfb = 2 * tn * h0 * 4
        dinv = 2 * tn * 128 * 4                  # lane padded
        poolb = 2 * max(B, 8) * tn * 4
        pw = N * h0 * 2                          # bf16, resident
        out = 2 * max(B, 8) * max(h0, 128) * 4
        return adj + selfb + dinv + poolb + pw + out + (2 << 20)

    if requested is not None:
        assert N % requested == 0, "node count must be a multiple of the row tile"
        assert requested % 32 == 0 or requested == N, \
            "int8 adjacency wants a multiple-of-32 row tile (or the full extent)"
        return requested
    for tn in (1024, 512, 256, 128, 64, 32):
        if N % tn == 0 and vmem_need(tn) <= budget:
            return tn
    return N                                      # tiny graph: one full block


# -------------------------- wrapper ------------------------------------------
def pnet_forward(pos, adj_bin, deg, pool, params, *, tn=None):
    """PNET forward (eval mode).

    pos:     [N, Cin] f32 node positions
    adj_bin: [N, N]   int8 binary adjacency, adj_bin[d, s] = 1 iff edge s->d
    deg:     [N]      f32 in-degree (row sums of adj_bin)
    pool:    [B, N]   f32 mean-pooling matrix (1/nodes-per-graph at members)
    """
    N = pos.shape[0]
    B = pool.shape[0]
    h0 = params["sage_wl"].shape[1]
    f32, bf16 = jnp.float32, jnp.bfloat16

    budget = _vmem_budget_bytes()
    tn = _pick_row_tile(N, B, h0, budget, tn)
    n_blocks = N // tn
    # v7x: split the node-row stream across both TensorCores via a leading
    # "parallel" axis; each core builds its own partial pooled accumulator.
    splits = 2 if (n_blocks % 2 == 0 and n_blocks >= 2) else 1
    inner = n_blocks // splits

    # XLA precompute (removes per-step K=cin matmuls + padded resident input).
    pw = jnp.dot(pos, params["sage_wl"]).astype(bf16)                        # [N, h0]
    selfb = (jnp.dot(pos, params["sage_wr"]) + params["sage_b"]).astype(f32)  # [N, h0]
    dinv = (1.0 / jnp.maximum(deg, 1.0)).astype(f32).reshape(N, 1)           # [N, 1]
    pool_blk = pool.reshape(B, n_blocks, tn).transpose(1, 0, 2).astype(f32)  # [nb,B,tn]

    grid_spec = pltpu.PrefetchScalarGridSpec(
        num_scalar_prefetch=0,
        grid=(splits, inner),
        in_specs=[
            pl.BlockSpec((tn, N), lambda c, i: (c * inner + i, 0)),           # adj (i8)
            pl.BlockSpec((tn, 1), lambda c, i: (c * inner + i, 0)),           # 1/deg
            pl.BlockSpec((tn, h0), lambda c, i: (c * inner + i, 0)),          # self term
            pl.BlockSpec((None, B, tn), lambda c, i: (c * inner + i, 0, 0)),  # pool cols
            pl.BlockSpec((N, h0), lambda c, i: (0, 0)),                       # pw (resident)
        ],
        out_specs=pl.BlockSpec((None, B, h0), lambda c, i: (c, 0, 0)),
    )

    partial_pool = pl.pallas_call(
        _sage_pool_kernel,
        out_shape=jax.ShapeDtypeStruct((splits, B, h0), f32),
        grid_spec=grid_spec,
        compiler_params=pltpu.CompilerParams(
            dimension_semantics=("parallel", "arbitrary"),
            vmem_limit_bytes=budget),
    )(adj_bin, dinv, selfb, pool_blk, pw)

    g = partial_pool.sum(axis=0)                                             # [B, h0]

    # ---- tiny decoder epilogue (M=B matmuls) in plain XLA, per review ----
    p = params
    g = jnp.maximum(g @ p["c1_w"] + p["c1_b"], 0.0)   # Conv1d(k=1)+Dropout(id)+ReLU
    g = jnp.maximum(g @ p["c2_w"] + p["c2_b"], 0.0)
    z1 = g @ p["d1_w"] + p["d1_b"]
    z2 = jnp.concatenate([z1, g], axis=1) @ p["d2_w"] + p["d2_b"]
    z3 = jnp.concatenate([z2, z1], axis=1) @ p["d3_w"] + p["d3_b"]
    z4 = jnp.concatenate([z3, z2], axis=1) @ p["d4_w"] + p["d4_b"]
    logits = z4 @ p["out_w"] + p["out_b"]
    return logits, jnp.argmax(logits, axis=-1)


# -------------------------- pure-JAX reference -------------------------------
def pnet_reference(pos, adj_bin, deg, pool, p):
    adj_norm = adj_bin.astype(jnp.float32) / jnp.maximum(deg, 1.0)[:, None]
    agg = adj_norm @ pos
    h = jnp.maximum(agg @ p["sage_wl"] + pos @ p["sage_wr"] + p["sage_b"], 0.0)
    g = pool @ h
    g = jnp.maximum(g @ p["c1_w"] + p["c1_b"], 0.0)
    g = jnp.maximum(g @ p["c2_w"] + p["c2_b"], 0.0)
    z1 = g @ p["d1_w"] + p["d1_b"]
    z2 = jnp.concatenate([z1, g], axis=1) @ p["d2_w"] + p["d2_b"]
    z3 = jnp.concatenate([z2, z1], axis=1) @ p["d3_w"] + p["d3_b"]
    z4 = jnp.concatenate([z3, z2], axis=1) @ p["d4_w"] + p["d4_b"]
    logits = z4 @ p["out_w"] + p["out_b"]
    return logits, jnp.argmax(logits, axis=-1)


# -------------------------- setup / main --------------------------------------
def _init_params(key, cin, h0, h1, h2, out_ch):
    ks = jax.random.split(key, 16)
    n = lambda k, s: jax.random.normal(k, s, jnp.float32) * 0.1
    return {
        # SAGEConv(cin -> h0), mean aggr: lin_l (with bias) + lin_r (no bias)
        "sage_wl": n(ks[0], (cin, h0)),
        "sage_wr": n(ks[1], (cin, h0)),
        "sage_b":  n(ks[2], (1, h0)),
        # Conv1d(k=1): h0 -> h1 -> h2(=256)
        "c1_w": n(ks[3], (h0, h1)), "c1_b": n(ks[4], (1, h1)),
        "c2_w": n(ks[5], (h1, h2)), "c2_b": n(ks[6], (1, h2)),
        # decoders
        "d1_w": n(ks[7], (256, 128)),       "d1_b": n(ks[8], (1, 128)),
        "d2_w": n(ks[9], (128 + 256, 64)),  "d2_b": n(ks[10], (1, 64)),
        "d3_w": n(ks[11], (64 + 128, 64)),  "d3_b": n(ks[12], (1, 64)),
        "d4_w": n(ks[13], (64 + 64, 64)),   "d4_b": n(ks[14], (1, 64)),
        "out_w": n(ks[15], (64, out_ch)),
        "out_b": jnp.zeros((1, out_ch), jnp.float32),
    }


if __name__ == "__main__":
    # Small synthetic mesh-graph batch: 2 graphs x 64 nodes, 3-D positions.
    N_PER, B = 64, 2
    N = N_PER * B
    IN_CH = 3
    H0, H1, H2 = 64, 128, 256   # hidden_channels (last must be 256: decoder_1 = Linear(256,128))
    OUT_CH = 8                  # number of classes
    TN = 32                     # -> 4 row blocks = 2-way core split x 2 inner steps

    key = jax.random.PRNGKey(0)
    k_pos, k_par, k_es, k_ed = jax.random.split(key, 4)

    pos = jax.random.normal(k_pos, (N, IN_CH), jnp.float32)

    # edge_index (face is None branch): bidirectional ring per graph plus some
    # random intra-graph edges (non-power-of-two in-degrees exercise the exact
    # f32 1/deg path).
    srcs, dsts = [], []
    for g in range(B):
        idx = jnp.arange(N_PER) + g * N_PER
        nxt = (jnp.arange(N_PER) + 1) % N_PER + g * N_PER
        srcs += [idx, nxt]
        dsts += [nxt, idx]
    offs = (jnp.arange(B) * N_PER)[:, None]
    extra_s = (jax.random.randint(k_es, (B, 3 * N_PER), 0, N_PER) + offs).reshape(-1)
    extra_d = (jax.random.randint(k_ed, (B, 3 * N_PER), 0, N_PER) + offs).reshape(-1)
    keep = extra_s != extra_d                  # drop self loops
    srcs.append(extra_s[keep])
    dsts.append(extra_d[keep])
    src = jnp.concatenate(srcs)
    dst = jnp.concatenate(dsts)
    batch = jnp.concatenate([jnp.full((N_PER,), g, jnp.int32) for g in range(B)])

    # Binary adjacency (messages flow src -> dst; mean over incoming edges).
    A = jnp.zeros((N, N), jnp.float32).at[dst, src].add(1.0)
    adj_bin = (A > 0).astype(jnp.int8)
    deg = adj_bin.astype(jnp.float32).sum(axis=1)

    # Mean-pooling matrix for global_mean_pool.
    onehot = (batch[None, :] == jnp.arange(B, dtype=jnp.int32)[:, None]).astype(jnp.float32)
    pool = onehot / jnp.maximum(onehot.sum(axis=1, keepdims=True), 1.0)

    params = _init_params(k_par, IN_CH, H0, H1, H2, OUT_CH)

    logits, pred = jax.block_until_ready(
        pnet_forward(pos, adj_bin, deg, pool, params, tn=TN))

    ref_logits, ref_pred = pnet_reference(pos, adj_bin, deg, pool, params)
    assert logits.shape == (B, OUT_CH) and pred.shape == (B,)
    assert jnp.allclose(logits, ref_logits, rtol=2e-2, atol=2e-2), "logits mismatch"
    # bf16-robust argmax check: exact match, or the reference logit gap at the
    # predicted class is within the numerical tolerance.
    ref_at_pred = jnp.take_along_axis(ref_logits, pred[:, None], axis=1)[:, 0]
    gap = ref_logits.max(axis=-1) - ref_at_pred
    assert bool(jnp.all((pred == ref_pred) | (gap <= 2e-2))), "argmax mismatch"

    print("KERNEL_OK")
</pallas_src>

<mosaic_0001>
module attributes {stable_mosaic.version = 11 : i64} {
  func.func @_sage_pool_kernel(%arg0: i32, %arg1: i32, %arg2: memref<32x128xi8, #tpu.memory_space<vmem>>, %arg3: memref<32x1xf32, #tpu.memory_space<vmem>>, %arg4: memref<32x64xf32, #tpu.memory_space<vmem>>, %arg5: memref<1x2x32xf32, #tpu.memory_space<vmem>>, %arg6: memref<128x64xbf16, #tpu.memory_space<vmem>>, %arg7: memref<1x2x64xf32, #tpu.memory_space<vmem>>) attributes {dimension_semantics = [#tpu.dimension_semantics<parallel>, #tpu.dimension_semantics<arbitrary>], iteration_bounds = array<i64: 2, 2>, scalar_prefetch = 0 : i64, scratch_operands = 0 : i64, tpu.core_type = #tpu.core_type<tc>, window_params = [{transform_indices = @transform_0, window_bounds = array<i64: 32, 128>}, {transform_indices = @transform_1, window_bounds = array<i64: 32, 1>}, {transform_indices = @transform_2, window_bounds = array<i64: 32, 64>}, {transform_indices = @transform_3, window_bounds = array<i64: 1, 2, 32>}, {pipeline_mode = #tpu.pipeline_mode<synchronous>, transform_indices = @transform_4, window_bounds = array<i64: 128, 64>}, {transform_indices = @transform_5, window_bounds = array<i64: 1, 2, 64>}]} {
    %c0_i32 = arith.constant 0 : i32
    %0 = arith.cmpi eq, %arg1, %c0_i32 : i32
    %1 = arith.extui %0 : i1 to i32
    %c0_i32_0 = arith.constant 0 : i32
    %2 = arith.cmpi ne, %1, %c0_i32_0 : i32
    scf.if %2 {
      %cst_19 = arith.constant 0.000000e+00 : f32
      %23 = vector.broadcast %cst_19 : f32 to vector<2x64xf32>
      %c0_20 = arith.constant 0 : index
      %c0_21 = arith.constant 0 : index
      %c0_22 = arith.constant 0 : index
      %24 = vector.load %arg7[%c0_20, %c0_21, %c0_22] : memref<1x2x64xf32, #tpu.memory_space<vmem>>, vector<1x2x64xf32>
      %25 = vector.shape_cast %24 : vector<1x2x64xf32> to vector<2x64xf32>
      %26 = vector.shape_cast %23 : vector<2x64xf32> to vector<1x2x64xf32>
      tpu.vector_store %arg7[%c0_20, %c0_21, %c0_22], %26 {strides = array<i32>} : memref<1x2x64xf32, #tpu.memory_space<vmem>>, vector<1x2x64xf32>,
    } else {
    }
    %c0 = arith.constant 0 : index
    %c0_1 = arith.constant 0 : index
    %3 = vector.load %arg2[%c0, %c0_1] : memref<32x128xi8, #tpu.memory_space<vmem>>, vector<32x128xi8>
    %4 = arith.sitofp %3 : vector<32x128xi8> to vector<32x128xbf16>
    %c0_2 = arith.constant 0 : index
    %c0_3 = arith.constant 0 : index
    %5 = vector.load %arg6[%c0_2, %c0_3] : memref<128x64xbf16, #tpu.memory_space<vmem>>, vector<128x64xbf16>
    %cst = arith.constant dense<0.000000e+00> : vector<32x64xf32>
    %6 = tpu.matmul %4, %5, %cst {dimension_numbers = #tpu.dot_dimension_numbers<[1], [0], [0], [1], [0, 0, 1, 1], [], []>} : vector<32x128xbf16>, vector<128x64xbf16>, vector<32x64xf32> -> vector<32x64xf32>
    %c0_4 = arith.constant 0 : index
    %c0_5 = arith.constant 0 : index
    %7 = vector.load %arg3[%c0_4, %c0_5] : memref<32x1xf32, #tpu.memory_space<vmem>>, vector<32x1xf32>
    %8 = vector.broadcast %7 : vector<32x1xf32> to vector<32x64xf32>
    %9 = arith.mulf %6, %8 : vector<32x64xf32>
    %c0_6 = arith.constant 0 : index
    %c0_7 = arith.constant 0 : index
    %10 = vector.load %arg4[%c0_6, %c0_7] : memref<32x64xf32, #tpu.memory_space<vmem>>, vector<32x64xf32>
    %11 = arith.addf %9, %10 : vector<32x64xf32>
    %cst_8 = arith.constant 0.000000e+00 : f32
    %12 = vector.broadcast %cst_8 : f32 to vector<32x64xf32>
    %13 = arith.maximumf %11, %12 : vector<32x64xf32>
    %c0_9 = arith.constant 0 : index
    %c0_10 = arith.constant 0 : index
    %c0_11 = arith.constant 0 : index
    %14 = vector.load %arg7[%c0_9, %c0_10, %c0_11] : memref<1x2x64xf32, #tpu.memory_space<vmem>>, vector<1x2x64xf32>
    %15 = vector.shape_cast %14 : vector<1x2x64xf32> to vector<2x64xf32>
    %c0_12 = arith.constant 0 : index
    %c0_13 = arith.constant 0 : index
    %c0_14 = arith.constant 0 : index
    %16 = vector.load %arg5[%c0_12, %c0_13, %c0_14] : memref<1x2x32xf32, #tpu.memory_space<vmem>>, vector<1x2x32xf32>
    %17 = vector.shape_cast %16 : vector<1x2x32xf32> to vector<2x32xf32>
    %cst_15 = arith.constant dense<0.000000e+00> : vector<2x64xf32>
    %18 = tpu.matmul %17, %13, %cst_15 {dimension_numbers = #tpu.dot_dimension_numbers<[1], [0], [0], [1], [0, 0, 1, 1], [], []>} : vector<2x32xf32>, vector<32x64xf32>, vector<2x64xf32> -> vector<2x64xf32>
    %19 = arith.addf %15, %18 : vector<2x64xf32>
    %c0_16 = arith.constant 0 : index
    %c0_17 = arith.constant 0 : index
    %c0_18 = arith.constant 0 : index
    %20 = vector.load %arg7[%c0_16, %c0_17, %c0_18] : memref<1x2x64xf32, #tpu.memory_space<vmem>>, vector<1x2x64xf32>
    %21 = vector.shape_cast %20 : vector<1x2x64xf32> to vector<2x64xf32>
    %22 = vector.shape_cast %19 : vector<2x64xf32> to vector<1x2x64xf32>
    tpu.vector_store %arg7[%c0_16, %c0_17, %c0_18], %22 {strides = array<i32>} : memref<1x2x64xf32, #tpu.memory_space<vmem>>, vector<1x2x64xf32>,
    return
  }
  func.func @transform_0(%arg0: i32, %arg1: i32) -> (i32, i32) {
    %c2_i32 = arith.constant 2 : i32
    %0 = arith.muli %arg0, %c2_i32 : i32
    %1 = arith.addi %0, %arg1 : i32
    %c0_i32 = arith.constant 0 : i32
    %c0_i32_0 = arith.constant 0 : i32
    return %1, %c0_i32 : i32, i32
  }
  func.func @transform_1(%arg0: i32, %arg1: i32) -> (i32, i32) {
    %c2_i32 = arith.constant 2 : i32
    %0 = arith.muli %arg0, %c2_i32 : i32
    %1 = arith.addi %0, %arg1 : i32
    %c0_i32 = arith.constant 0 : i32
    %c0_i32_0 = arith.constant 0 : i32
    return %1, %c0_i32 : i32, i32
  }
  func.func @transform_2(%arg0: i32, %arg1: i32) -> (i32, i32) {
    %c2_i32 = arith.constant 2 : i32
    %0 = arith.muli %arg0, %c2_i32 : i32
    %1 = arith.addi %0, %arg1 : i32
    %c0_i32 = arith.constant 0 : i32
    %c0_i32_0 = arith.constant 0 : i32
    return %1, %c0_i32 : i32, i32
  }
  func.func @transform_3(%arg0: i32, %arg1: i32) -> (i32, i32, i32) {
    %c2_i32 = arith.constant 2 : i32
    %0 = arith.muli %arg0, %c2_i32 : i32
    %1 = arith.addi %0, %arg1 : i32
    %c0_i32 = arith.constant 0 : i32
    %c0_i32_0 = arith.constant 0 : i32
    %c0_i32_1 = arith.constant 0 : i32
    return %1, %c0_i32, %c0_i32_0 : i32, i32, i32
  }
  func.func @transform_4(%arg0: i32, %arg1: i32) -> (i32, i32) {
    %c0_i32 = arith.constant 0 : i32
    %c0_i32_0 = arith.constant 0 : i32
    %c0_i32_1 = arith.constant 0 : i32
    return %c0_i32, %c0_i32_0 : i32, i32
  }
  func.func @transform_5(%arg0: i32, %arg1: i32) -> (i32, i32, i32) {
    %c0_i32 = arith.constant 0 : i32
    %c0_i32_0 = arith.constant 0 : i32
    %c0_i32_1 = arith.constant 0 : i32
    return %arg0, %c0_i32, %c0_i32_0 : i32, i32, i32
  }
}

</mosaic_0001>

<bundles_post_ra>
// kernel: tpu_custom_call.1
= control target key start
LH: loop header
LB: loop body
LE: loop exit
PB: predicated region body
PF: predicated region fallthrough
CT: control target
= control target key end

     0   :  { %10 = vsyncpa [#allocation3], 0  ;;  %s1187_s0 = inlined_call_operand.vmem [shape: s8[128,128], index: 0, kind: input, shape index: {}]   ;;  %s1188_s1 = inlined_call_operand.vmem [shape: f32[128,1], index: 1, kind: input, shape index: {}]   ;;  %s1189_s2 = inlined_call_operand.vmem [shape: f32[128,64], index: 2, kind: input, shape index: {}]   ;;  %s1190_s3 = inlined_call_operand.vmem [shape: f32[4,2,32], index: 3, kind: input, shape index: {}]   ;;  %s1191_s4 = inlined_call_operand.vmem [shape: bf16[128,64], index: 4, kind: input, shape index: {}]   ;;  %s1192_s5 = inlined_call_operand.hbm [shape: f32[2,2,64], index: 5, kind: output, shape index: {}]  }
   0x1   :  { %12 = vsyncpa [#allocation3 + $0x1], 0  ;;  %s1009_s18 = smov 0   ;;  %s1011_s19 = smov 0  }
   0x2   :  { %s1013_s20 = smov 0   ;;  %s1015_s21 = smov 0  }
   0x3   :  { %s1017_s22 = smov 0   ;;  %s1019_s23 = smov 0  }
   0x4   :  { %s1021_s24 = smov 0   ;;  %s1023_s25 = smov 0  }
   0x5 LB: > { %1198 = sst [smem:[#allocation5_spill]] %s952_s20  ;;  %s711_s26 = sadd.s32 4294967295, %s972_s25   ;;  %s972_s25 = sphi %s1023_s25, %s18_s25   ;;  %s968_s24 = sphi %s1021_s24, %s1212_s24   ;;  %s964_s23 = sphi %s1019_s23, %s1211_s23   ;;  %s960_s22 = sphi %s1017_s22, %s1210_s22   ;;  %s956_s21 = sphi %s1015_s21, %s1209_s21   ;;  %s952_s20 = sphi %s1013_s20, %s1208_s20   ;;  %s948_s19 = sphi %s1011_s19, %s1214_s19   ;;  %s944_s18 = sphi %s1009_s18, %s1213_s18  }
   0x6   : > { %1199 = sst [smem:[#allocation6_spill]] %s964_s23  ;;  %s712_s27 = sadd.s32 4294967294, %s972_s25  }
   0x7   : > { %1200 = sst [smem:[#allocation7_spill]] %s968_s24  ;;  %s27_s28 = sadd.s32 1, %s964_s23 }
   0x8   : > { %p28_p0 = scmp.ge.s32.totalorder %s27_s28, 2  ;;  %s30_s29 = sadd.s32 1, %s968_s24 }
   0x9   : > { %p188_p1 = scmp.ne.s32.totalorder %s952_s20, %s948_s19  ;;  %p189_p2 = scmp.eq.s32.totalorder %s711_s26, 3 }
   0xa   : > { %s1216_s28 = smov (%p28_p0, %s27_s28), 0  ;;  %s1218_s29 = smov (!%p28_p0, %s30_s29), %s968_s24 }
   0xb   : > { %1201 = sst [smem:[#allocation8_spill]] %s1216_s28  ;;  %p1058_p3 = por %p189_p2, %p188_p1 }
   0xc   : > { %p194_p4 = scmp.ne.s32.totalorder %s948_s19, %s944_s18  ;;  %p32_p5 = scmp.ge.s32.totalorder %s1218_s29, 2 }
   0xd   : > { %p195_p6 = scmp.eq.s32.totalorder %s712_s27, 3  ;;  %p723_p7 = scmp.ge.s32.totalorder %s972_s25, 1 }
   0xe   : > { %p264_p8 = scmp.lt.s32.totalorder %s972_s25, 5  ;;  %s1220_s29 = smov (%p32_p5, %s1218_s29), 0 }
   0xf   : > { %1203 = sst [smem:[#allocation9_spill]] %s1220_s29  ;;  %p1068_p9 = por %p195_p6, %p194_p4 }
  0x10   : > { %p265_p10 = pnand %p723_p7, %p264_p8  ;;  %s175_s7 = ssub.s32 %s968_s24, %s1220_s29 }
  0x11   : > { %s178_s8 = sadd.s32 1, %s952_s20  ;;  %p176_p11 = scmp.eq.s32.totalorder %s175_s7, 0 }
  0x12   : > { %268 = sbr.rel (%p265_p10) target bundleno = 487 (0x1e7), region = 40  ;;  %s1195_s10 = sand.u32 (!%p265_p10), 1, %s948_s19  }
  0x13   : > { %s1076_s9 = scalar_select %p176_p11, %s952_s20, %s178_s8  }
  0x14   : > { %s725_s11 = sshll.u32 (!%p265_p10), %s960_s22, 1  ;;  %s724_s12 = sshll.u32 (!%p265_p10), %s1195_s10, 1 }
  0x15   : > { %1205 = sst [smem:[#allocation10_spill]] %s1076_s9  ;;  %s314_s13 = sadd.s32 (!%p265_p10), %s956_s21, %s725_s11 }
  0x16   : > { %p315_p12 = scmp.lt.s32.totalorder (!%p265_p10), %s314_s13, 3  ;;  %s728_s14 = sshll.u32 (!%p265_p10), %s314_s13, 2 }
  0x17   : > { %p324_p13 = scmp.lt.s32.totalorder %s728_s14, 15  ;;  %p735_p0 = scmp.ne.s32.totalorder %s956_s21, 0 }
  0x18   : > { %s1222_s13 = smov (!%p315_p12, %s314_s13), 3 }
  0x19   : > { %s726_s15 = sshll.u32 %s1222_s13, 3  ;;  %s734_s16 = sshll.u32 %s1222_s13, 1 }
  0x1a   : > { %s318_s27 = scalar_lea.vmem %s1187_s0, %s726_s15  ;;  %s1089_s29 = scalar_lea.vmem %s1190_s3, %s734_s16 }
  0x1b   : > { %s1224_s14 = smov (!%p324_p13, %s728_s14), 15  ;;  %s1099_s13 = scalar_lea.vmem [#allocation2], %s724_s12 }
  0x1c   : > { %s729_s28 = sshll.u32 %s1224_s14, 3  ;;  %353 = sbr.rel (%p735_p0) target bundleno = 35 (0x23), region = 44 }
  0x1d   : > { %s327_s11 = scalar_lea.vmem %s1188_s1, %s729_s28  ;;  %s1097_s20 = scalar_lea.vmem %s1189_s2, %s729_s28 }
  0x21   : > { %vm354_vm0 = vcmask 517120   ;;  %v974_v0 = vmov 0.0  }
  0x22   : > { %355 = vst.msk [vmem:[%s1099_s13] sm:$0x3] %vm354_vm0, %v974_v0 }
  0x23 PF: > { %v872_v1 = vld [vmem:[%s1191_s4 + $0x38] sm:$0xff]   ;;  %v873_v2 = vld [vmem:[%s1191_s4 + $0x30] sm:$0xff]   ;;  %v975_v3 = vmov 0   ;;  %v874_v4 = vld [vmem:[%s1191_s4 + $0x28] sm:$0xff]   ;;  %v976_v17 = vmov 0.0   ;;  %vm977_vm1 = vmmov 0  }
  0x24   : > { %870 = vset.pattern.permute.xlu0 %v975_v3  ;;  %871 = vset.pattern.permute.xlu1 %v975_v3  ;;  %v875_v5 = vld [vmem:[%s1191_s4 + $0x20] sm:$0xff]   ;;  %v475_v7 = vld [vmem:[%s327_s11 + $0x18] sm:$0xff]  ;;  %v473_v8 = vld [vmem:[%s327_s11 + $0x8] sm:$0xff]  ;;  %vm514_vm2 = vcmask 261120   ;;  %s605_s14 = sshll.u32 %s1099_s13, 4  ;;  %vm589_vm3 = vcmask 517120   ;;  %s606_s14 = int_to_ptr.vmem [resolvable:$true] %s605_s14 }
  0x25   : > { %764 = vmatprep.subr.bf16.mxu0 %v872_v1  ;;  %v356_v6 = vld [vmem:[%s318_s27] sm:$0xff]  ;;  %493 = vperm.xlu0 %870, %v475_v7   ;;  %v474_v10 = vld [vmem:[%s327_s11 + $0x10] sm:$0xff]  ;;  %v876_v12 = vld [vmem:[%s1191_s4 + $0x18] sm:$0xff]   ;;  %s880_s23 = scalar_lea.vmem %s606_s14, 32 }
  0x26   : > { %765 = vmatpush3.bf16.msra.mxu0 %v872_v1  ;;  %v357_v9 = vunpack.c.l.s8.bf16 %v356_v6  ;;  %483 = vperm.xlu1 %871, %v473_v8   ;;  %v472_v11 = vld [vmem:[%s327_s11] sm:$0xff]  ;;  %v877_v13 = vld [vmem:[%s1191_s4 + $0x10] sm:$0xff]   ;;  %v878_v14 = vld [vmem:[%s1191_s4 + $0x8] sm:$0xff]   ;;  %v358_v16 = vunpack.c.h.s8.bf16 %v356_v6  ;;  %p881_p1 = scmp.ne.s32.totalorder %s606_s14, %s880_s23 }
  0x27   : > { %766 = vmatprep.subr.bf16.mxu0 %v873_v2  ;;  %v879_v15 = vld [vmem:[%s1191_s4] sm:$0xff]   ;;  %784 = vmatprep.subr.mxu1 %v976_v17  ;;  %v502_v24 = vld [vmem:[%s1097_s20 + $0x10] sm:$0xff]  ;;  %v503_v27 = vld [vmem:[%s1097_s20 + $0x18] sm:$0xff] }
  0x28   : > { %780 = vmatprep.mubr.bf16.mxu0 %v357_v9  ;;  %792 = vmatprep.mubr.msk.f32.mxu1 %vm977_vm1, %v976_v17  ;;  %v501_v30 = vld [vmem:[%s1097_s20 + $0x8] sm:$0xff]  ;;  %v500_v35 = vld [vmem:[%s1097_s20] sm:$0xff]  ;;  %s746_s20 = sshll.u32 %s960_s22, 5  ;;  %p882_p2 = pnand %p881_p1, %p1058_p3 }
  0x29   : > { %488 = vperm.xlu0 %870, %v474_v10   ;;  %v513_v42 = vld [vmem:[%s1089_s29] sm:$0x3]  ;;  %s1138_s10 = scalar_lea.hbm %s1192_s5, %s746_s20  ;;  %s1206_s29 = sand.u32 1, %s948_s19  }
  0x2a   : > { %767 = vmatpush3.bf16.msra.mxu0 %v873_v2  ;;  %478 = vperm.xlu1 %871, %v472_v11   ;;  %v512_v43 = vld [vmem:[%s1099_s13] sm:$0x3]  ;;  %s592_s21 = scalar_lea.sflag [#allocation3], %s1206_s29  ;;  %p883_p4 = pneg %p882_p2 }
  0x2b   : > { %768 = vmatprep.subr.bf16.mxu0 %v874_v4  ;;  %s978_s22 = smov [#allocation2]  }
  0x2c   : > { %s884_s28 = sshll.u32 %s978_s22, 4  ;;  %s885_s28 = int_to_ptr.vmem [resolvable:$false] %s884_s28 }
  0x2d   : > { %s886_s9 = scalar_lea.vmem %s885_s28, 64  ;;  %p887_p5 = scmp.lt.s32.totalorder %s606_s14, %s885_s28 }
  0x2e   : > { %769 = vmatpush3.bf16.msra.mxu0 %v874_v4  ;;  %p888_p6 = scmp.lt.s32.totalorder %s886_s9, %s880_s23 }
  0x2f   : > { %770 = vmatprep.subr.bf16.mxu0 %v875_v5 }
  0x30   : > { %p889_p7 = por %p888_p6, %p887_p5 }
  0x32   : > { %771 = vmatpush3.bf16.msra.mxu0 %v875_v5  ;;  %p890_p8 = pnand %p889_p7, %p883_p4 }
  0x33   : > { %772 = vmatprep.subr.bf16.mxu0 %v876_v12 }
  0x36   : > { %773 = vmatpush3.bf16.msra.mxu0 %v876_v12 }
  0x37   : > { %774 = vmatprep.subr.bf16.mxu0 %v877_v13 }
  0x3a   : > { %775 = vmatpush3.bf16.msra.mxu0 %v877_v13 }
  0x3b   : > { %776 = vmatprep.subr.bf16.mxu0 %v878_v14 }
  0x3e   : > { %777 = vmatpush3.bf16.msra.mxu0 %v878_v14 }
  0x3f   : > { %778 = vmatprep.subr.bf16.mxu0 %v879_v15 }
  0x42   : > { %779 = vmatpush3.bf16.msra.mxu0 %v879_v15 }
  0x45   : > { %781 = vmatmul.mubr.bf16.vlgmr.msra.gmra.mxu0 %v358_v16 }
  0xa0   : > { %v494_v18 = vpop.permute.xlu0 %493 }
  0xa1   : > { %v484_v19 = vpop.permute.xlu1 %483 }
  0xa4   : > { %v489_v20 = vpop.permute.xlu0 %488 }
  0xa5   : > { %v479_v25 = vpop.permute.xlu1 %478 }
 0x105   : > { %v782_v21 = vpop.f32.mrf.mxu0 }
 0x106   : > { %v498_v23 = vmul.f32 %v782_v21, %v489_v20 }
 0x107   : > { %v457_v22 = vpop.f32.mrf.mxu0 }
 0x108   : > { %v506_v31 = vadd.f32 %v502_v24, %v498_v23  ;;  %v496_v32 = vmul.f32 %v479_v25, %v457_v22 }
 0x109   : > { %v783_v26 = vpop.f32.mrf.mxu0 }
 0x10a   : > { %v499_v28 = vmul.f32 %v783_v26, %v494_v18  ;;  %v510_v38 = vmax.f32 %v506_v31, 0.0  ;;  %v504_v39 = vadd.f32 %v500_v35, %v496_v32 }
 0x10b   : > { %v460_v29 = vpop.f32.mrf.mxu0 }
 0x10c   : > { %v497_v33 = vmul.f32 %v484_v19, %v460_v29  ;;  %v507_v34 = vadd.f32 %v503_v27, %v499_v28  ;;  %v508_v41 = vmax.f32 %v504_v39, 0.0 }
 0x10e   : > { %v505_v36 = vadd.f32 %v501_v30, %v497_v33  ;;  %v511_v37 = vmax.f32 %v507_v34, 0.0 }
 0x110   : > { %785 = vmatpush3.msra.mxu1 %v511_v37  ;;  %v509_v40 = vmax.f32 %v505_v36, 0.0 }
 0x111   : > { %786 = vmatprep.subr.mxu1 %v976_v17 }
 0x112   : > { %787 = vmatpush3.msra.mxu1 %v510_v38 }
 0x113   : > { %788 = vmatprep.subr.mxu1 %v976_v17 }
 0x114   : > { %789 = vmatpush3.msra.mxu1 %v509_v40 }
 0x115   : > { %790 = vmatprep.subr.mxu1 %v976_v17 }
 0x116   : > { %791 = vmatpush3.msra.mxu1 %v508_v41 }
 0x117   : > { %793 = vmatmul.mubr.msk.f32.vlgmr.msra.gmra.mxu1 %vm514_vm2, %v513_v42 }
 0x1d7   : > { %v584_v44 = vpop.f32.mrf.mxu1 }
 0x1d8   : > { %v588_v45 = vadd.f32 %v584_v44, %v512_v43 }
 0x1d9   : > { %v794_v46 = vpop.f32.mrf.mxu1 }
 0x1da   : > { %590 = vst.msk [vmem:[%s1099_s13] sm:$0x3] %vm589_vm3, %v588_v45 }
 0x1db   : > { %893 = shalt.err (!%p890_p8)
}
 0x1dc   : > { %s894_s13 = scalar_lea.hbm %s1138_s10, 32  ;;  %s898_s17 = scalar_lea.hbm %s1192_s5, 64 }
 0x1dd   : > { %p895_p10 = scmp.ne.s32.totalorder %s1138_s10, %s894_s13  ;;  %p899_p13 = scmp.lt.s32.totalorder %s1138_s10, %s1192_s5 }
 0x1de   : > { %p900_p0 = scmp.lt.s32.totalorder %s898_s17, %s894_s13 }
 0x1df   : > { %p896_p11 = pnand %p895_p10, %p1058_p3 }
 0x1e0   : > { %p901_p1 = por %p900_p0, %p899_p13 }
 0x1e1   : > { %p897_p12 = pneg %p896_p11 }
 0x1e3   : > { %p902_p2 = pnand %p901_p1, %p897_p12 }
 0x1e5   : > { %905 = shalt.err (!%p902_p2)
}
 0x1e6   : > { %795 = dma.vmem_to_hbm [thread:$0]  (%p1058_p3), %s606_s14, 32, %s1138_s10, %s592_s21  }
 0x1e7 PF: > { %p801_p4 = scmp.ge.s32.totalorder %s972_s25, 2  ;;  %s617_s7 = sand.u32 1, %s944_s18  }
 0x1e8   : > { %s618_s8 = scalar_lea.sflag [#allocation3], %s617_s7 }
 0x1e9   : > { %p798_p5 = pnand %p801_p4, %p1068_p9 }
 0x1eb   : > { %p799_p6 = pneg %p798_p5 }
 0x1ed   : > { %939 = dma.done.wait (%p799_p6), %s618_s8, 32  }
 0x1ee   : > { %941 = vsyncadd (%p799_p6), %s618_s8, 4294967264  ;;  %s18_s25 = sadd.s32 1, %s972_s25   ;;  %s1207_s11 = sld [smem:[#allocation5_spill]] }
 0x1ef   : > { %p15_p7 = scmp.ge.s32.totalorder %s18_s25, 6   ;;  %s1208_s20 = sld [smem:[#allocation10_spill]] }
 0x1f0   : > { %s1209_s21 = sld [smem:[#allocation6_spill]]  ;;  %s1213_s18 = smov %s948_s19 }
 0x1f1   : > { %s1210_s22 = sld [smem:[#allocation7_spill]]  ;;  %17 = sbr.rel (!%p15_p7) target bundleno = 5 (0x5), region = 88 }
 0x1f2   : > { %s1211_s23 = sld [smem:[#allocation8_spill]] }
 0x1f3   : > { %s1212_s24 = sld [smem:[#allocation9_spill]] }
 0x1f4   : > { %s1214_s19 = smov %s1207_s11 }
 0x1f6   :  { %623 = vsyncpa [#allocation3], 1 }
 0x1f7   :  { %625 = vsyncpa [#allocation3 + $0x1], 1 }

</bundles_post_ra>
